<compile_context>
chip_gen: v7x
topology: tpu7x:2x2x1
jax: 0.10.0
libtpu: 0.0.40
codegen_flags: <defaults>
</compile_context>

<pallas_src>
import jax
import jax.numpy as jnp
from jax.experimental import pallas as pl
from jax.experimental.pallas import tpu as pltpu

EPS = 1e-5
H1, H2, H3 = 256, 128, 64
H3P = 128     # fc3 output padded 64 -> 128 lanes
OUTP = 128    # fc4 output padded output_dim -> 128 lanes


def _round_up(n, m):
    return ((n + m - 1) // m) * m


def _dqn_kernel(x_ref, w1_ref, w2_ref, w3_ref, w4_ref, b_ref, out_ref):
    """fc1/bn1/relu -> fc2/bn2/relu -> fc3/bn3/relu -> fc4, with BN pre-folded.

    Weights are bf16 (in, out); b_ref is a packed (8, 256) f32 tile:
      row 0: folded bias1 (256)   row 1: folded bias2 (128)
      row 2: folded bias3 (128, zero-padded)   row 3: bias4 (128, zero-padded)
    Matmuls run on the MXU with f32 accumulation; bias add / ReLU stay in f32.
    """
    bp = b_ref[...]                                  # (8, 256) f32
    x = x_ref[...].astype(jnp.bfloat16)

    h = jnp.dot(x, w1_ref[...], preferred_element_type=jnp.float32)
    h = jnp.maximum(h + bp[0:1, :], 0.0)             # (TB, 256)

    h = jnp.dot(h.astype(jnp.bfloat16), w2_ref[...],
                preferred_element_type=jnp.float32)
    h = jnp.maximum(h + bp[1:2, :H2], 0.0)           # (TB, 128)

    h = jnp.dot(h.astype(jnp.bfloat16), w3_ref[...],
                preferred_element_type=jnp.float32)
    h = jnp.maximum(h + bp[2:3, :H3P], 0.0)          # (TB, 128) cols 64: stay 0

    out = jnp.dot(h.astype(jnp.bfloat16), w4_ref[...],
                  preferred_element_type=jnp.float32)
    out_ref[...] = (out + bp[3:4, :OUTP]).astype(out_ref.dtype)


def _fold_bn(w, b, gamma, beta, mean, var):
    """Fold eval-mode BatchNorm1d into the preceding Linear (f32 algebra)."""
    scale = gamma * jax.lax.rsqrt(var + EPS)         # (1, C)
    return w * scale, (b - mean) * scale + beta


@jax.jit
def enhanced_dqn_forward(x, params):
    batch, input_dim = x.shape
    output_dim = params["w4"].shape[1]

    # ---------- trace-time folding / packing / padding (all constants) ----------
    w1, b1 = _fold_bn(params["w1"], params["b1"], params["g1"], params["be1"],
                      params["m1"], params["v1"])
    w2, b2 = _fold_bn(params["w2"], params["b2"], params["g2"], params["be2"],
                      params["m2"], params["v2"])
    w3, b3 = _fold_bn(params["w3"], params["b3"], params["g3"], params["be3"],
                      params["m3"], params["v3"])
    w4, b4 = params["w4"], params["b4"]

    # Pad the 64-wide hidden layer and the tiny output to full 128-lane tiles.
    w3 = jnp.pad(w3, ((0, 0), (0, H3P - H3)))
    b3 = jnp.pad(b3, ((0, 0), (0, H3P - H3)))
    w4 = jnp.pad(w4, ((0, H3P - H3), (0, OUTP - output_dim)))
    b4 = jnp.pad(b4, ((0, 0), (0, OUTP - output_dim)))

    # bf16 weights: weight bytes dominate HBM traffic; MXU-native input dtype.
    w1b, w2b, w3b, w4b = (w.astype(jnp.bfloat16) for w in (w1, w2, w3, w4))

    # Pack all biases into one (8, 256) f32 tile (one DMA instead of many).
    bpack = jnp.zeros((8, H1), jnp.float32)
    bpack = bpack.at[0, :H1].set(b1[0])
    bpack = bpack.at[1, :H2].set(b2[0])
    bpack = bpack.at[2, :H3P].set(b3[0])
    bpack = bpack.at[3, :OUTP].set(b4[0])

    # ---------- batch tiling: grid over batch, weights VMEM-resident ----------
    tb = min(256, _round_up(batch, 8))
    b_pad = _round_up(batch, tb)
    xp = x if b_pad == batch else jnp.pad(x, ((0, b_pad - batch), (0, 0)))

    out = pl.pallas_call(
        _dqn_kernel,
        out_shape=jax.ShapeDtypeStruct((b_pad, OUTP), jnp.float32),
        grid=(b_pad // tb,),
        in_specs=[
            pl.BlockSpec((tb, input_dim), lambda i: (i, 0)),   # x: tiled over batch
            pl.BlockSpec((input_dim, H1), lambda i: (0, 0)),   # weights: resident
            pl.BlockSpec((H1, H2), lambda i: (0, 0)),
            pl.BlockSpec((H2, H3P), lambda i: (0, 0)),
            pl.BlockSpec((H3P, OUTP), lambda i: (0, 0)),
            pl.BlockSpec((8, H1), lambda i: (0, 0)),           # packed biases
        ],
        out_specs=pl.BlockSpec((tb, OUTP), lambda i: (i, 0)),
        compiler_params=pltpu.CompilerParams(
            dimension_semantics=("parallel",),
            vmem_limit_bytes=16 << 20,
        ),
    )(xp, w1b, w2b, w3b, w4b, bpack)

    return out[:batch, :output_dim]


def init_params(key, input_dim, output_dim):
    """Mirror nn.Linear default init (U(-1/sqrt(in), 1/sqrt(in))), weights stored
    transposed as (in, out). BatchNorm params/running stats are NON-trivial so
    the correctness check actually exercises the BN folding."""
    dims = [input_dim, H1, H2, H3, output_dim]
    keys = jax.random.split(key, 11)
    params = {}
    for i in range(4):
        fan_in, fan_out = dims[i], dims[i + 1]
        bound = 1.0 / jnp.sqrt(jnp.float32(fan_in))
        params[f"w{i+1}"] = jax.random.uniform(
            keys[2 * i], (fan_in, fan_out), jnp.float32, -bound, bound)
        params[f"b{i+1}"] = jax.random.uniform(
            keys[2 * i + 1], (1, fan_out), jnp.float32, -bound, bound)
    for j, c in enumerate([H1, H2, H3]):
        kg, kb, km, kv = jax.random.split(keys[8 + j], 4)
        params[f"g{j+1}"] = jax.random.uniform(kg, (1, c), jnp.float32, 0.5, 1.5)
        params[f"be{j+1}"] = 0.1 * jax.random.normal(kb, (1, c), jnp.float32)
        params[f"m{j+1}"] = 0.1 * jax.random.normal(km, (1, c), jnp.float32)
        params[f"v{j+1}"] = jax.random.uniform(kv, (1, c), jnp.float32, 0.5, 1.5)
    return params


def reference_forward(x, params):
    """Pure-JAX f32 reference of the original (unfolded) eval-mode forward."""
    h = x.astype(jnp.float32)
    for i in (1, 2, 3):
        h = h @ params[f"w{i}"] + params[f"b{i}"]
        h = (h - params[f"m{i}"]) * jax.lax.rsqrt(params[f"v{i}"] + EPS) \
            * params[f"g{i}"] + params[f"be{i}"]
        h = jnp.maximum(h, 0.0)  # dropout is identity in eval mode
    return h @ params["w4"] + params["b4"]


if __name__ == "__main__":
    # Small shapes consistent with the module: state vector input, Q-value output.
    batch, input_dim, output_dim = 8, 32, 4

    key = jax.random.PRNGKey(0)
    k_x, k_p = jax.random.split(key)
    x = jax.random.normal(k_x, (batch, input_dim), jnp.float32)
    params = init_params(k_p, input_dim, output_dim)

    out = enhanced_dqn_forward(x, params)
    out = jax.block_until_ready(out)

    ref = reference_forward(x, params)
    assert out.shape == (batch, output_dim)
    # Tolerance accounts for bf16 weight/activation quantization (f32 accumulate);
    # observed error is ~1e-3, so 2e-2 is a comfortable margin.
    assert jnp.allclose(out, ref, atol=2e-2, rtol=2e-2), "mismatch vs reference"

    print("KERNEL_OK")
</pallas_src>

<mosaic_0001>
module attributes {stable_mosaic.version = 11 : i64} {
  func.func @_dqn_kernel(%arg0: i32, %arg1: memref<8x32xf32, #tpu.memory_space<vmem>>, %arg2: memref<32x256xbf16, #tpu.memory_space<vmem>>, %arg3: memref<256x128xbf16, #tpu.memory_space<vmem>>, %arg4: memref<128x128xbf16, #tpu.memory_space<vmem>>, %arg5: memref<128x128xbf16, #tpu.memory_space<vmem>>, %arg6: memref<8x256xf32, #tpu.memory_space<vmem>>, %arg7: memref<8x128xf32, #tpu.memory_space<vmem>>) attributes {dimension_semantics = [#tpu.dimension_semantics<parallel>], iteration_bounds = array<i64: 1>, scalar_prefetch = 0 : i64, scratch_operands = 0 : i64, tpu.core_type = #tpu.core_type<tc>, window_params = [{transform_indices = @transform_0, window_bounds = array<i64: 8, 32>}, {pipeline_mode = #tpu.pipeline_mode<synchronous>, transform_indices = @transform_1, window_bounds = array<i64: 32, 256>}, {pipeline_mode = #tpu.pipeline_mode<synchronous>, transform_indices = @transform_2, window_bounds = array<i64: 256, 128>}, {pipeline_mode = #tpu.pipeline_mode<synchronous>, transform_indices = @transform_3, window_bounds = array<i64: 128, 128>}, {pipeline_mode = #tpu.pipeline_mode<synchronous>, transform_indices = @transform_4, window_bounds = array<i64: 128, 128>}, {pipeline_mode = #tpu.pipeline_mode<synchronous>, transform_indices = @transform_5, window_bounds = array<i64: 8, 256>}, {transform_indices = @transform_6, window_bounds = array<i64: 8, 128>}]} {
    %c0 = arith.constant 0 : index
    %c0_0 = arith.constant 0 : index
    %0 = vector.load %arg6[%c0, %c0_0] : memref<8x256xf32, #tpu.memory_space<vmem>>, vector<8x256xf32>
    %c0_1 = arith.constant 0 : index
    %c0_2 = arith.constant 0 : index
    %1 = vector.load %arg1[%c0_1, %c0_2] : memref<8x32xf32, #tpu.memory_space<vmem>>, vector<8x32xf32>
    %2 = arith.truncf %1 : vector<8x32xf32> to vector<8x32xbf16>
    %c0_3 = arith.constant 0 : index
    %c0_4 = arith.constant 0 : index
    %3 = vector.load %arg2[%c0_3, %c0_4] : memref<32x256xbf16, #tpu.memory_space<vmem>>, vector<32x256xbf16>
    %cst = arith.constant dense<0.000000e+00> : vector<8x256xf32>
    %4 = tpu.matmul %2, %3, %cst {dimension_numbers = #tpu.dot_dimension_numbers<[1], [0], [0], [1], [0, 0, 1, 1], [], []>} : vector<8x32xbf16>, vector<32x256xbf16>, vector<8x256xf32> -> vector<8x256xf32>
    %5 = vector.extract_strided_slice %0 {offsets = [0, 0], sizes = [1, 256], strides = [1, 1]} : vector<8x256xf32> to vector<1x256xf32>
    %6 = vector.broadcast %5 : vector<1x256xf32> to vector<8x256xf32>
    %7 = arith.addf %4, %6 : vector<8x256xf32>
    %cst_5 = arith.constant 0.000000e+00 : f32
    %8 = vector.broadcast %cst_5 : f32 to vector<8x256xf32>
    %9 = arith.maximumf %7, %8 : vector<8x256xf32>
    %10 = arith.truncf %9 : vector<8x256xf32> to vector<8x256xbf16>
    %c0_6 = arith.constant 0 : index
    %c0_7 = arith.constant 0 : index
    %11 = vector.load %arg3[%c0_6, %c0_7] : memref<256x128xbf16, #tpu.memory_space<vmem>>, vector<256x128xbf16>
    %cst_8 = arith.constant dense<0.000000e+00> : vector<8x128xf32>
    %12 = tpu.matmul %10, %11, %cst_8 {dimension_numbers = #tpu.dot_dimension_numbers<[1], [0], [0], [1], [0, 0, 1, 1], [], []>} : vector<8x256xbf16>, vector<256x128xbf16>, vector<8x128xf32> -> vector<8x128xf32>
    %13 = vector.extract_strided_slice %0 {offsets = [1, 0], sizes = [1, 128], strides = [1, 1]} : vector<8x256xf32> to vector<1x128xf32>
    %14 = vector.broadcast %13 : vector<1x128xf32> to vector<8x128xf32>
    %15 = arith.addf %12, %14 : vector<8x128xf32>
    %cst_9 = arith.constant 0.000000e+00 : f32
    %16 = vector.broadcast %cst_9 : f32 to vector<8x128xf32>
    %17 = arith.maximumf %15, %16 : vector<8x128xf32>
    %18 = arith.truncf %17 : vector<8x128xf32> to vector<8x128xbf16>
    %c0_10 = arith.constant 0 : index
    %c0_11 = arith.constant 0 : index
    %19 = vector.load %arg4[%c0_10, %c0_11] : memref<128x128xbf16, #tpu.memory_space<vmem>>, vector<128x128xbf16>
    %cst_12 = arith.constant dense<0.000000e+00> : vector<8x128xf32>
    %20 = tpu.matmul %18, %19, %cst_12 {dimension_numbers = #tpu.dot_dimension_numbers<[1], [0], [0], [1], [0, 0, 1, 1], [], []>} : vector<8x128xbf16>, vector<128x128xbf16>, vector<8x128xf32> -> vector<8x128xf32>
    %21 = vector.extract_strided_slice %0 {offsets = [2, 0], sizes = [1, 128], strides = [1, 1]} : vector<8x256xf32> to vector<1x128xf32>
    %22 = vector.broadcast %21 : vector<1x128xf32> to vector<8x128xf32>
    %23 = arith.addf %20, %22 : vector<8x128xf32>
    %cst_13 = arith.constant 0.000000e+00 : f32
    %24 = vector.broadcast %cst_13 : f32 to vector<8x128xf32>
    %25 = arith.maximumf %23, %24 : vector<8x128xf32>
    %26 = arith.truncf %25 : vector<8x128xf32> to vector<8x128xbf16>
    %c0_14 = arith.constant 0 : index
    %c0_15 = arith.constant 0 : index
    %27 = vector.load %arg5[%c0_14, %c0_15] : memref<128x128xbf16, #tpu.memory_space<vmem>>, vector<128x128xbf16>
    %cst_16 = arith.constant dense<0.000000e+00> : vector<8x128xf32>
    %28 = tpu.matmul %26, %27, %cst_16 {dimension_numbers = #tpu.dot_dimension_numbers<[1], [0], [0], [1], [0, 0, 1, 1], [], []>} : vector<8x128xbf16>, vector<128x128xbf16>, vector<8x128xf32> -> vector<8x128xf32>
    %29 = vector.extract_strided_slice %0 {offsets = [3, 0], sizes = [1, 128], strides = [1, 1]} : vector<8x256xf32> to vector<1x128xf32>
    %30 = vector.broadcast %29 : vector<1x128xf32> to vector<8x128xf32>
    %31 = arith.addf %28, %30 : vector<8x128xf32>
    %c0_17 = arith.constant 0 : index
    %c0_18 = arith.constant 0 : index
    %32 = vector.load %arg7[%c0_17, %c0_18] : memref<8x128xf32, #tpu.memory_space<vmem>>, vector<8x128xf32>
    tpu.vector_store %arg7[%c0_17, %c0_18], %31 {strides = array<i32>} : memref<8x128xf32, #tpu.memory_space<vmem>>, vector<8x128xf32>,
    return
  }
  func.func @transform_0(%arg0: i32) -> (i32, i32) {
    %c0_i32 = arith.constant 0 : i32
    %c0_i32_0 = arith.constant 0 : i32
    return %arg0, %c0_i32 : i32, i32
  }
  func.func @transform_1(%arg0: i32) -> (i32, i32) {
    %c0_i32 = arith.constant 0 : i32
    %c0_i32_0 = arith.constant 0 : i32
    %c0_i32_1 = arith.constant 0 : i32
    return %c0_i32, %c0_i32_0 : i32, i32
  }
  func.func @transform_2(%arg0: i32) -> (i32, i32) {
    %c0_i32 = arith.constant 0 : i32
    %c0_i32_0 = arith.constant 0 : i32
    %c0_i32_1 = arith.constant 0 : i32
    return %c0_i32, %c0_i32_0 : i32, i32
  }
  func.func @transform_3(%arg0: i32) -> (i32, i32) {
    %c0_i32 = arith.constant 0 : i32
    %c0_i32_0 = arith.constant 0 : i32
    %c0_i32_1 = arith.constant 0 : i32
    return %c0_i32, %c0_i32_0 : i32, i32
  }
  func.func @transform_4(%arg0: i32) -> (i32, i32) {
    %c0_i32 = arith.constant 0 : i32
    %c0_i32_0 = arith.constant 0 : i32
    %c0_i32_1 = arith.constant 0 : i32
    return %c0_i32, %c0_i32_0 : i32, i32
  }
  func.func @transform_5(%arg0: i32) -> (i32, i32) {
    %c0_i32 = arith.constant 0 : i32
    %c0_i32_0 = arith.constant 0 : i32
    %c0_i32_1 = arith.constant 0 : i32
    return %c0_i32, %c0_i32_0 : i32, i32
  }
  func.func @transform_6(%arg0: i32) -> (i32, i32) {
    %c0_i32 = arith.constant 0 : i32
    %c0_i32_0 = arith.constant 0 : i32
    return %arg0, %c0_i32 : i32, i32
  }
}

</mosaic_0001>

<bundles_post_ra>
// kernel: enhanced_dqn_forward.1
= control target key start
LH: loop header
LB: loop body
LE: loop exit
PB: predicated region body
PF: predicated region fallthrough
CT: control target
= control target key end

     0   :  { %v664_v1 = vmov 0   ;;  %vm60_vm0 = vcmask 261120   ;;  %v665_v23 = vmov 0.0   ;;  %v32_v30 = vlaneseq  ;;  %s852_s1 = inlined_call_operand.vmem [shape: bf16[32,256], index: 1, kind: input, shape index: {}]   ;;  %s853_s0 = inlined_call_operand.vmem [shape: f32[8,32], index: 0, kind: input, shape index: {}]   ;;  %s854_s2 = inlined_call_operand.vmem [shape: bf16[256,128], index: 2, kind: input, shape index: {}]   ;;  %s855_s3 = inlined_call_operand.vmem [shape: bf16[128,128], index: 3, kind: input, shape index: {}]   ;;  %s856_s5 = inlined_call_operand.vmem [shape: f32[8,256], index: 5, kind: input, shape index: {}]   ;;  %s857_s4 = inlined_call_operand.vmem [shape: bf16[128,128], index: 4, kind: input, shape index: {}]   ;;  %s858_s6 = inlined_call_operand.vmem [shape: f32[8,128], index: 6, kind: output, shape index: {}]  }
   0x1   :  { %v626_v0 = vld [vmem:[%s852_s1 + $0x4] ss:$8 sps:$4 sm:$0xff]   ;;  %96 = vmatprep.mubr.bf16.mxu0 %v664_v1  ;;  %v628_v2 = vld [vmem:[%s852_s1] ss:$8 sps:$4 sm:$0xff]   ;;  %v629_v3 = vld [vmem:[%s852_s1 + $0x14] ss:$8 sps:$4 sm:$0xff]  }
   0x2   :  { %64 = vmatprep.subr.bf16.mxu0 %v626_v0  ;;  %v631_v4 = vld [vmem:[%s852_s1 + $0x10] ss:$8 sps:$4 sm:$0xff]   ;;  %v26_v5 = vld [vmem:[%s853_s0] sm:$0xff]  ;;  %v634_v8 = vld [vmem:[%s854_s2 + $0x48] sm:$0xff]   ;;  %v791_v31 = vshrl.u32 %v32_v30, 7  ;;  %vm666_vm1 = vmmov 0  }
   0x3   :  { %65 = vmatpush1.bf16.msra.mxu0 %v628_v2  ;;  %v632_v6 = vld [vmem:[%s854_s2 + $0x40] sm:$0xff]   ;;  %v27_v9 = vpack.c.bf16 %v26_v5, %v26_v5  ;;  %v635_v10 = vld [vmem:[%s854_s2 + $0x8] sm:$0xff]   ;;  %v636_v11 = vld [vmem:[%s854_s2 + $0x50] sm:$0xff]  }
   0x4   :  { %66 = vmatprep.subr.bf16.mxu0 %v629_v3  ;;  %v633_v7 = vld [vmem:[%s854_s2] sm:$0xff]   ;;  %543 = vmatprep.subr.bf16.mxu1 %v632_v6  ;;  %v637_v12 = vld [vmem:[%s854_s2 + $0x10] sm:$0xff]   ;;  %v638_v13 = vld [vmem:[%s854_s2 + $0x58] sm:$0xff]   ;;  %v34_v32 = vsub.s32 0, %v791_v31  ;;  %v143_v55 = vsub.s32 1, %v791_v31  ;;  %v301_v3 = vsub.s32 2, %v791_v31 }
   0x5   :  { %544 = vmatpush3.bf16.msra.mxu1 %v633_v7  ;;  %v639_v14 = vld [vmem:[%s854_s2 + $0x18] sm:$0xff]   ;;  %v640_v15 = vld [vmem:[%s854_s2 + $0x60] sm:$0xff]   ;;  %v642_v17 = vld [vmem:[%s854_s2 + $0x68] sm:$0xff]  }
   0x6   :  { %545 = vmatprep.subr.bf16.mxu1 %v634_v8  ;;  %v641_v16 = vld [vmem:[%s854_s2 + $0x20] sm:$0xff]   ;;  %v643_v18 = vld [vmem:[%s854_s2 + $0x28] sm:$0xff]   ;;  %v644_v19 = vld [vmem:[%s854_s2 + $0x70] sm:$0xff]  }
   0x7   :  { %67 = vmatpush1.bf16.msra.mxu0 %v631_v4  ;;  %v645_v20 = vld [vmem:[%s854_s2 + $0x30] sm:$0xff]   ;;  %v646_v21 = vld [vmem:[%s854_s2 + $0x78] sm:$0xff]   ;;  %v648_v24 = vld [vmem:[%s855_s3] sm:$0xff]  }
   0x8   :  { %v647_v22 = vld [vmem:[%s854_s2 + $0x38] sm:$0xff]   ;;  %583 = vmatprep.subr.bf16.mxu0 %v665_v23  ;;  %v649_v25 = vld [vmem:[%s855_s3 + $0x8] sm:$0xff]   ;;  %v650_v26 = vld [vmem:[%s855_s3 + $0x10] sm:$0xff]  }
   0x9   :  { %546 = vmatpush3.bf16.msra.mxu1 %v635_v10  ;;  %v651_v27 = vld [vmem:[%s855_s3 + $0x18] sm:$0xff]   ;;  %v652_v28 = vld [vmem:[%s855_s3 + $0x20] sm:$0xff]   ;;  %v653_v29 = vld [vmem:[%s855_s3 + $0x28] sm:$0xff]  }
   0xa   :  { %510 = vmatmul.mubr.msk.bf16.vlgmr.msra.gmra.mrb[0].mxu0 %vm60_vm0, %v27_v9  ;;  %547 = vmatprep.subr.bf16.mxu1 %v636_v11  ;;  %v797_v33 = vld [vmem:[%s856_s5] sm:$0xff]  ;;  %v25_v34 = vld [vmem:[%s856_s5 + $0x8] sm:$0xff]  ;;  %v654_v47 = vld [vmem:[%s855_s3 + $0x30] sm:$0xff]  }
   0xb   :  { %584 = vmatpush3.bf16.msra.mxu0 %v648_v24  ;;  %v35_v35 = vrot.slane %v797_v33, %v34_v32  ;;  %v39_v36 = vrot.slane %v25_v34, %v34_v32  ;;  %v655_v48 = vld [vmem:[%s855_s3 + $0x38] sm:$0xff]   ;;  %599 = vmatprep.mubr.msk.bf16.mxu0 %vm666_vm1, %v665_v23  ;;  %v656_v49 = vld [vmem:[%s857_s4] sm:$0xff]   ;;  %v657_v50 = vld [vmem:[%s857_s4 + $0x8] sm:$0xff]   ;;  %v144_v57 = vrot.slane %v797_v33, %v143_v55 }
   0xc   :  { %585 = vmatprep.subr.bf16.mxu0 %v665_v23  ;;  %v658_v51 = vld [vmem:[%s857_s4 + $0x10] sm:$0xff]   ;;  %v659_v52 = vld [vmem:[%s857_s4 + $0x18] sm:$0xff]   ;;  %v660_v53 = vld [vmem:[%s857_s4 + $0x20] sm:$0xff]   ;;  %v302_v4 = vrot.slane %v797_v33, %v301_v3 }
   0xd   :  { %548 = vmatpush3.bf16.msra.mxu1 %v637_v12  ;;  %v661_v54 = vld [vmem:[%s857_s4 + $0x28] sm:$0xff]   ;;  %v662_v1 = vld [vmem:[%s857_s4 + $0x30] sm:$0xff]   ;;  %v663_v2 = vld [vmem:[%s857_s4 + $0x38] sm:$0xff]   ;;  %v411_v12 = vsub.s32 3, %v791_v31 }
   0xe   :  { %549 = vmatprep.subr.bf16.mxu1 %v638_v13 }
   0xf   :  { %586 = vmatpush3.bf16.msra.mxu0 %v649_v25  ;;  %v412_v13 = vrot.slane %v797_v33, %v411_v12 }
  0x10   :  { %587 = vmatprep.subr.bf16.mxu0 %v665_v23 }
  0x11   :  { %550 = vmatpush3.bf16.msra.mxu1 %v639_v14 }
  0x12   :  { %551 = vmatprep.subr.bf16.mxu1 %v640_v15 }
  0x13   :  { %588 = vmatpush3.bf16.msra.mxu0 %v650_v26 }
  0x14   :  { %589 = vmatprep.subr.bf16.mxu0 %v665_v23 }
  0x15   :  { %552 = vmatpush3.bf16.msra.mxu1 %v641_v16 }
  0x16   :  { %553 = vmatprep.subr.bf16.mxu1 %v642_v17 }
  0x17   :  { %590 = vmatpush3.bf16.msra.mxu0 %v651_v27 }
  0x18   :  { %591 = vmatprep.subr.bf16.mxu0 %v665_v23 }
  0x19   :  { %554 = vmatpush3.bf16.msra.mxu1 %v643_v18 }
  0x1a   :  { %555 = vmatprep.subr.bf16.mxu1 %v644_v19 }
  0x1b   :  { %592 = vmatpush3.bf16.msra.mxu0 %v652_v28 }
  0x1c   :  { %593 = vmatprep.subr.bf16.mxu0 %v665_v23 }
  0x1d   :  { %556 = vmatpush3.bf16.msra.mxu1 %v645_v20 }
  0x1e   :  { %557 = vmatprep.subr.bf16.mxu1 %v646_v21 }
  0x1f   :  { %594 = vmatpush3.bf16.msra.mxu0 %v653_v29 }
  0x20   :  { %595 = vmatprep.subr.bf16.mxu0 %v665_v23 }
  0x21   :  { %558 = vmatpush3.bf16.msra.mxu1 %v647_v22 }
  0x22   :  { %603 = vmatprep.subr.bf16.mxu1 %v665_v23 }
  0x23   :  { %596 = vmatpush3.bf16.msra.mxu0 %v654_v47 }
  0x24   :  { %597 = vmatprep.subr.bf16.mxu0 %v665_v23 }
  0x27   :  { %598 = vmatpush3.bf16.msra.mxu0 %v655_v48 }
  0xdd   :  { %v98_v37 = vpop.f32.mrb[0].mxu0 }
  0xde   :  { %v99_v38 = vadd.f32 %v98_v37, %v35_v35  ;;  %v100_v39 = vpop.f32.mrb[1].mxu0 }
  0xdf   :  { %v101_v40 = vadd.f32 %v100_v39, %v39_v36  ;;  %v102_v41 = vpop.f32.mrb[2].mxu0 }
  0xe0   :  { %v105_v42 = vmax.f32 %v99_v38, 0.0  ;;  %v103_v43 = vpop.f32.mrb[3].mxu0 }
  0xe1   :  { %v106_v44 = vmax.f32 %v101_v40, 0.0 }
  0xe2   :  { %v107_v46 = vpack.c.bf16 %v105_v42, %v105_v42 }
  0xe3   :  { %v108_v45 = vpack.c.bf16 %v106_v44, %v106_v44 }
  0xe5   :  { %273 = vmatprep.mubr.bf16.mxu1 %v108_v45 }
  0xe6   :  { %274 = vmatmul.mubr.bf16.vlgmr.msra.gmra.mrb[0].mxu1 %v107_v46 }
  0xe7   :  { %619 = vmatprep.mubr.msk.bf16.mxu1 %vm666_vm1, %v665_v23  ;;  %604 = vmatpush3.bf16.msra.mxu1 %v656_v49 }
  0xe8   :  { %605 = vmatprep.subr.bf16.mxu1 %v665_v23 }
  0xeb   :  { %606 = vmatpush3.bf16.msra.mxu1 %v657_v50 }
  0xec   :  { %607 = vmatprep.subr.bf16.mxu1 %v665_v23 }
  0xef   :  { %608 = vmatpush3.bf16.msra.mxu1 %v658_v51 }
  0xf0   :  { %609 = vmatprep.subr.bf16.mxu1 %v665_v23 }
  0xf3   :  { %610 = vmatpush3.bf16.msra.mxu1 %v659_v52 }
  0xf4   :  { %611 = vmatprep.subr.bf16.mxu1 %v665_v23 }
  0xf7   :  { %612 = vmatpush3.bf16.msra.mxu1 %v660_v53 }
  0xf8   :  { %613 = vmatprep.subr.bf16.mxu1 %v665_v23 }
  0xfb   :  { %614 = vmatpush3.bf16.msra.mxu1 %v661_v54 }
  0xfc   :  { %615 = vmatprep.subr.bf16.mxu1 %v665_v23 }
  0xff   :  { %616 = vmatpush3.bf16.msra.mxu1 %v662_v1 }
 0x100   :  { %617 = vmatprep.subr.bf16.mxu1 %v665_v23 }
 0x103   :  { %618 = vmatpush3.bf16.msra.mxu1 %v663_v2 }
 0x1b9   :  { %v559_v56 = vpop.f32.mrb[0].mxu1 }
 0x1ba   :  { %v560_v58 = vpop.f32.mrb[1].mxu1 }
 0x1bb   :  { %v561_v59 = vadd.f32 %v560_v58, %v559_v56  ;;  %v562_v60 = vpop.f32.mrb[2].mxu1 }
 0x1bc   :  { %v563_v61 = vpop.f32.mrb[3].mxu1 }
 0x1bd   :  { %v276_v62 = vadd.f32 %v561_v59, %v144_v57 }
 0x1bf   :  { %v281_v63 = vmax.f32 %v276_v62, 0.0 }
 0x1c1   :  { %v282_v0 = vpack.c.bf16 %v281_v63, %v281_v63 }
 0x1c3   :  { %600 = vmatmul.mubr.bf16.vlgmr.msra.gmra.mrb[4].mxu0 %v282_v0 }
 0x296   :  { %v385_v5 = vpop.f32.mrb[4].mxu0 }
 0x297   :  { %v386_v6 = vadd.f32 %v385_v5, %v302_v4  ;;  %v601_v7 = vpop.f32.mrb[5].mxu0 }
 0x298   :  { %v388_v8 = vpop.f32.mrb[6].mxu0 }
 0x299   :  { %v391_v9 = vmax.f32 %v386_v6, 0.0  ;;  %v602_v10 = vpop.f32.mrb[7].mxu0 }
 0x29b   :  { %v392_v11 = vpack.c.bf16 %v391_v9, %v391_v9 }
 0x29d   :  { %620 = vmatmul.mubr.bf16.vlgmr.msra.gmra.mrb[4].mxu1 %v392_v11 }
 0x370   :  { %v495_v14 = vpop.f32.mrb[4].mxu1 }
 0x371   :  { %v496_v15 = vadd.f32 %v495_v14, %v412_v13  ;;  %v621_v16 = vpop.f32.mrb[5].mxu1 }
 0x372   :  { %v498_v17 = vpop.f32.mrb[6].mxu1 }
 0x373   :  { %501 = vst [vmem:[%s858_s6] sm:$0xff] %v496_v15  ;;  %v622_v18 = vpop.f32.mrb[7].mxu1 }

</bundles_post_ra>
